<compile_context>
chip_gen: v7x
topology: tpu7x:2x2x1
jax: 0.10.0
libtpu: 0.0.40
codegen_flags: <defaults>
</compile_context>

<pallas_src>
import functools

import jax
import jax.numpy as jnp
from jax.experimental import pallas as pl
from jax.experimental.pallas import tpu as pltpu


def _tversky_sums_kernel(logit_ref, true_ref, out_ref,
                         pt_acc, t_acc, p_acc, *, L, TL):
    """Accumulates per-row [sum(p*t), sum(t), sum(p)] over spatial tiles.

    out_ref block shape: (TR, 3) -- col 0 = sum(p*t), col 1 = sum(t),
    col 2 = sum(p).  pt_acc/t_acc/p_acc are (TR, 128) f32 VMEM scratch that
    hold lane-tile partial sums; the cross-lane reduce happens once per row
    block (on the last column step).
    """
    j = pl.program_id(1)
    nj = pl.num_programs(1)

    @pl.when(j == 0)
    def _():
        pt_acc[...] = jnp.zeros_like(pt_acc)
        t_acc[...] = jnp.zeros_like(t_acc)
        p_acc[...] = jnp.zeros_like(p_acc)

    p = jax.nn.sigmoid(logit_ref[...].astype(jnp.float32))
    t = true_ref[...].astype(jnp.float32)

    if L % TL != 0:
        # Mask the ragged last column tile (columns >= L contribute nothing).
        col = jax.lax.broadcasted_iota(jnp.int32, logit_ref.shape, 1) + j * TL
        valid = col < L
        p = jnp.where(valid, p, 0.0)
        t = jnp.where(valid, t, 0.0)

    pt = p * t

    def fold128(x):
        # (TR, TL) -> (TR, 128): add lane-tile-aligned column slices.
        # Pure elementwise VPU adds; no relayout, no cross-lane traffic.
        acc = x[:, 0:128]
        for k in range(1, TL // 128):
            acc = acc + x[:, k * 128:(k + 1) * 128]
        return acc

    pt_acc[...] += fold128(pt)
    t_acc[...] += fold128(t)
    p_acc[...] += fold128(p)

    @pl.when(j == nj - 1)
    def _():
        tp = jnp.sum(pt_acc[...], axis=1, keepdims=True)
        st = jnp.sum(t_acc[...], axis=1, keepdims=True)
        sp = jnp.sum(p_acc[...], axis=1, keepdims=True)
        out_ref[...] = jnp.concatenate([tp, st, sp], axis=1)


@functools.partial(jax.jit, static_argnames=("alpha", "beta", "smooth"))
def tversky_loss(logits, true, *, alpha=0.5, beta=0.5, smooth=1e-6):
    """Pallas implementation of TverskyLoss.forward (returns a scalar)."""
    assert logits.shape == true.shape and logits.ndim == 4
    N, C, H, W = logits.shape
    R, L = N * C, H * W

    # Pure reshape (no copy, no dtype change): inputs stay in their native
    # dtype so HBM traffic is not inflated by a wrapper upcast.
    logits2d = logits.reshape(R, L)
    true2d = true.reshape(R, L)

    def rup(x, m):
        return ((x + m - 1) // m) * m

    # Block sizes: large enough to amortize per-step overhead, small enough
    # that 2 inputs x 2 pipeline buffers fit every generation's scoped VMEM
    # default (f32 worst case: 2 * 2 * 256*2048*4B = 8 MiB).
    TR = min(256, rup(R, 8))
    TL = min(2048, rup(L, 128))

    grid = (pl.cdiv(R, TR), pl.cdiv(L, TL))

    kernel = functools.partial(_tversky_sums_kernel, L=L, TL=TL)

    sums = pl.pallas_call(
        kernel,
        out_shape=jax.ShapeDtypeStruct((R, 3), jnp.float32),
        grid_spec=pltpu.PrefetchScalarGridSpec(
            num_scalar_prefetch=0,
            grid=grid,
            in_specs=[
                pl.BlockSpec((TR, TL), lambda i, j: (i, j)),
                pl.BlockSpec((TR, TL), lambda i, j: (i, j)),
            ],
            out_specs=pl.BlockSpec((TR, 3), lambda i, j: (i, 0)),
            scratch_shapes=[
                pltpu.VMEM((TR, 128), jnp.float32),
                pltpu.VMEM((TR, 128), jnp.float32),
                pltpu.VMEM((TR, 128), jnp.float32),
            ],
        ),
        compiler_params=pltpu.CompilerParams(
            dimension_semantics=("parallel", "arbitrary")),
    )(logits2d, true2d)

    # Tiny O(N*C) epilogue: Tversky ratio per row + mean.
    tp, st, sp = sums[:, 0], sums[:, 1], sums[:, 2]
    fn = st - tp
    fp = sp - tp
    tversky = (tp + smooth) / (tp + alpha * fn + beta * fp + smooth)
    return 1.0 - jnp.mean(tversky)


def _reference(logits, true, alpha=0.5, beta=0.5, smooth=1e-6):
    probs = jax.nn.sigmoid(logits.astype(jnp.float32))
    t = true.astype(jnp.float32)
    tp = jnp.sum(probs * t, axis=(2, 3))
    fn = jnp.sum((1 - probs) * t, axis=(2, 3))
    fp = jnp.sum(probs * (1 - t), axis=(2, 3))
    tv = (tp + smooth) / (tp + alpha * fn + beta * fp + smooth)
    return 1.0 - jnp.mean(tv)


if __name__ == "__main__":
    key = jax.random.PRNGKey(0)

    # Primary test: shapes matching the module spec.
    k1, k2, k3, k4 = jax.random.split(key, 4)
    N, C, H, W = 2, 4, 16, 16
    logits = jax.random.normal(k1, (N, C, H, W), dtype=jnp.float32)
    true = (jax.random.uniform(k2, (N, C, H, W)) > 0.5).astype(jnp.float32)

    loss = tversky_loss(logits, true)
    jax.block_until_ready(loss)
    ref = _reference(logits, true)
    assert jnp.allclose(loss, ref, atol=1e-5, rtol=1e-5), (loss, ref)

    # Secondary test: ragged spatial size exercising the in-kernel lane mask
    # and partial row block.
    N2, C2, H2, W2 = 2, 3, 17, 19
    logits2 = jax.random.normal(k3, (N2, C2, H2, W2), dtype=jnp.float32)
    true2 = (jax.random.uniform(k4, (N2, C2, H2, W2)) > 0.5).astype(jnp.float32)

    loss2 = tversky_loss(logits2, true2)
    jax.block_until_ready(loss2)
    ref2 = _reference(logits2, true2)
    assert jnp.allclose(loss2, ref2, atol=1e-5, rtol=1e-5), (loss2, ref2)

    print("KERNEL_OK")
</pallas_src>

<mosaic_0001>
module attributes {stable_mosaic.version = 11 : i64} {
  func.func @_tversky_sums_kernel(%arg0: i32, %arg1: i32, %arg2: memref<8x256xf32, #tpu.memory_space<vmem>>, %arg3: memref<8x256xf32, #tpu.memory_space<vmem>>, %arg4: memref<8x3xf32, #tpu.memory_space<vmem>>, %arg5: memref<8x128xf32, #tpu.memory_space<vmem>>, %arg6: memref<8x128xf32, #tpu.memory_space<vmem>>, %arg7: memref<8x128xf32, #tpu.memory_space<vmem>>) attributes {dimension_semantics = [#tpu.dimension_semantics<parallel>, #tpu.dimension_semantics<arbitrary>], iteration_bounds = array<i64: 1, 1>, scalar_prefetch = 0 : i64, scratch_operands = 3 : i64, tpu.core_type = #tpu.core_type<tc>, window_params = [{transform_indices = @transform_0, window_bounds = array<i64: 8, 256>}, {transform_indices = @transform_1, window_bounds = array<i64: 8, 256>}, {transform_indices = @transform_2, window_bounds = array<i64: 8, 3>}]} {
    %c0_i32 = arith.constant 0 : i32
    %0 = arith.cmpi eq, %arg1, %c0_i32 : i32
    %1 = arith.extui %0 : i1 to i32
    %c0_i32_0 = arith.constant 0 : i32
    %2 = arith.cmpi ne, %1, %c0_i32_0 : i32
    scf.if %2 {
      %cst_18 = arith.constant 0.000000e+00 : f32
      %32 = vector.broadcast %cst_18 : f32 to vector<8x128xf32>
      %c0_19 = arith.constant 0 : index
      %c0_20 = arith.constant 0 : index
      %33 = vector.load %arg5[%c0_19, %c0_20] : memref<8x128xf32, #tpu.memory_space<vmem>>, vector<8x128xf32>
      tpu.vector_store %arg5[%c0_19, %c0_20], %32 {strides = array<i32>} : memref<8x128xf32, #tpu.memory_space<vmem>>, vector<8x128xf32>,
      %cst_21 = arith.constant 0.000000e+00 : f32
      %34 = vector.broadcast %cst_21 : f32 to vector<8x128xf32>
      %c0_22 = arith.constant 0 : index
      %c0_23 = arith.constant 0 : index
      %35 = vector.load %arg6[%c0_22, %c0_23] : memref<8x128xf32, #tpu.memory_space<vmem>>, vector<8x128xf32>
      tpu.vector_store %arg6[%c0_22, %c0_23], %34 {strides = array<i32>} : memref<8x128xf32, #tpu.memory_space<vmem>>, vector<8x128xf32>,
      %cst_24 = arith.constant 0.000000e+00 : f32
      %36 = vector.broadcast %cst_24 : f32 to vector<8x128xf32>
      %c0_25 = arith.constant 0 : index
      %c0_26 = arith.constant 0 : index
      %37 = vector.load %arg7[%c0_25, %c0_26] : memref<8x128xf32, #tpu.memory_space<vmem>>, vector<8x128xf32>
      tpu.vector_store %arg7[%c0_25, %c0_26], %36 {strides = array<i32>} : memref<8x128xf32, #tpu.memory_space<vmem>>, vector<8x128xf32>,
    } else {
    }
    %c0 = arith.constant 0 : index
    %c0_1 = arith.constant 0 : index
    %3 = vector.load %arg2[%c0, %c0_1] : memref<8x256xf32, #tpu.memory_space<vmem>>, vector<8x256xf32>
    %4 = arith.negf %3 : vector<8x256xf32>
    %5 = math.exp %4 : vector<8x256xf32>
    %cst = arith.constant 1.000000e+00 : f32
    %6 = vector.broadcast %cst : f32 to vector<8x256xf32>
    %7 = arith.addf %6, %5 : vector<8x256xf32>
    %8 = arith.divf %6, %7 : vector<8x256xf32>
    %c0_2 = arith.constant 0 : index
    %c0_3 = arith.constant 0 : index
    %9 = vector.load %arg3[%c0_2, %c0_3] : memref<8x256xf32, #tpu.memory_space<vmem>>, vector<8x256xf32>
    %10 = arith.mulf %8, %9 : vector<8x256xf32>
    %c0_4 = arith.constant 0 : index
    %c0_5 = arith.constant 0 : index
    %11 = vector.load %arg5[%c0_4, %c0_5] : memref<8x128xf32, #tpu.memory_space<vmem>>, vector<8x128xf32>
    %12 = vector.extract_strided_slice %10 {offsets = [0, 0], sizes = [8, 128], strides = [1, 1]} : vector<8x256xf32> to vector<8x128xf32>
    %13 = vector.extract_strided_slice %10 {offsets = [0, 128], sizes = [8, 128], strides = [1, 1]} : vector<8x256xf32> to vector<8x128xf32>
    %14 = arith.addf %12, %13 : vector<8x128xf32>
    %15 = arith.addf %11, %14 : vector<8x128xf32>
    %c0_6 = arith.constant 0 : index
    %c0_7 = arith.constant 0 : index
    %16 = vector.load %arg5[%c0_6, %c0_7] : memref<8x128xf32, #tpu.memory_space<vmem>>, vector<8x128xf32>
    tpu.vector_store %arg5[%c0_6, %c0_7], %15 {strides = array<i32>} : memref<8x128xf32, #tpu.memory_space<vmem>>, vector<8x128xf32>,
    %c0_8 = arith.constant 0 : index
    %c0_9 = arith.constant 0 : index
    %17 = vector.load %arg6[%c0_8, %c0_9] : memref<8x128xf32, #tpu.memory_space<vmem>>, vector<8x128xf32>
    %18 = vector.extract_strided_slice %9 {offsets = [0, 0], sizes = [8, 128], strides = [1, 1]} : vector<8x256xf32> to vector<8x128xf32>
    %19 = vector.extract_strided_slice %9 {offsets = [0, 128], sizes = [8, 128], strides = [1, 1]} : vector<8x256xf32> to vector<8x128xf32>
    %20 = arith.addf %18, %19 : vector<8x128xf32>
    %21 = arith.addf %17, %20 : vector<8x128xf32>
    %c0_10 = arith.constant 0 : index
    %c0_11 = arith.constant 0 : index
    %22 = vector.load %arg6[%c0_10, %c0_11] : memref<8x128xf32, #tpu.memory_space<vmem>>, vector<8x128xf32>
    tpu.vector_store %arg6[%c0_10, %c0_11], %21 {strides = array<i32>} : memref<8x128xf32, #tpu.memory_space<vmem>>, vector<8x128xf32>,
    %c0_12 = arith.constant 0 : index
    %c0_13 = arith.constant 0 : index
    %23 = vector.load %arg7[%c0_12, %c0_13] : memref<8x128xf32, #tpu.memory_space<vmem>>, vector<8x128xf32>
    %24 = vector.extract_strided_slice %8 {offsets = [0, 0], sizes = [8, 128], strides = [1, 1]} : vector<8x256xf32> to vector<8x128xf32>
    %25 = vector.extract_strided_slice %8 {offsets = [0, 128], sizes = [8, 128], strides = [1, 1]} : vector<8x256xf32> to vector<8x128xf32>
    %26 = arith.addf %24, %25 : vector<8x128xf32>
    %27 = arith.addf %23, %26 : vector<8x128xf32>
    %c0_14 = arith.constant 0 : index
    %c0_15 = arith.constant 0 : index
    %28 = vector.load %arg7[%c0_14, %c0_15] : memref<8x128xf32, #tpu.memory_space<vmem>>, vector<8x128xf32>
    tpu.vector_store %arg7[%c0_14, %c0_15], %27 {strides = array<i32>} : memref<8x128xf32, #tpu.memory_space<vmem>>, vector<8x128xf32>,
    %c0_i32_16 = arith.constant 0 : i32
    %29 = arith.cmpi eq, %arg1, %c0_i32_16 : i32
    %30 = arith.extui %29 : i1 to i32
    %c0_i32_17 = arith.constant 0 : i32
    %31 = arith.cmpi ne, %30, %c0_i32_17 : i32
    scf.if %31 {
      %c0_18 = arith.constant 0 : index
      %c0_19 = arith.constant 0 : index
      %32 = vector.load %arg5[%c0_18, %c0_19] : memref<8x128xf32, #tpu.memory_space<vmem>>, vector<8x128xf32>
      %cst_20 = arith.constant dense<0.000000e+00> : vector<8xf32>
      %33 = vector.multi_reduction <add>, %32, %cst_20 [1] : vector<8x128xf32> to vector<8xf32>
      %34 = vector.shape_cast %33 : vector<8xf32> to vector<8x1xf32>
      %c0_21 = arith.constant 0 : index
      %c0_22 = arith.constant 0 : index
      %35 = vector.load %arg6[%c0_21, %c0_22] : memref<8x128xf32, #tpu.memory_space<vmem>>, vector<8x128xf32>
      %cst_23 = arith.constant dense<0.000000e+00> : vector<8xf32>
      %36 = vector.multi_reduction <add>, %35, %cst_23 [1] : vector<8x128xf32> to vector<8xf32>
      %37 = vector.shape_cast %36 : vector<8xf32> to vector<8x1xf32>
      %c0_24 = arith.constant 0 : index
      %c0_25 = arith.constant 0 : index
      %38 = vector.load %arg7[%c0_24, %c0_25] : memref<8x128xf32, #tpu.memory_space<vmem>>, vector<8x128xf32>
      %cst_26 = arith.constant dense<0.000000e+00> : vector<8xf32>
      %39 = vector.multi_reduction <add>, %38, %cst_26 [1] : vector<8x128xf32> to vector<8xf32>
      %40 = vector.shape_cast %39 : vector<8xf32> to vector<8x1xf32>
      %41 = tpu.concatenate %34, %37, %40 in 1 : vector<8x1xf32>, vector<8x1xf32>, vector<8x1xf32> -> vector<8x3xf32>
      %c0_27 = arith.constant 0 : index
      %c0_28 = arith.constant 0 : index
      %42 = vector.load %arg4[%c0_27, %c0_28] : memref<8x3xf32, #tpu.memory_space<vmem>>, vector<8x3xf32>
      tpu.vector_store %arg4[%c0_27, %c0_28], %41 {strides = array<i32>} : memref<8x3xf32, #tpu.memory_space<vmem>>, vector<8x3xf32>,
    } else {
    }
    return
  }
  func.func @transform_0(%arg0: i32, %arg1: i32) -> (i32, i32) {
    %c0_i32 = arith.constant 0 : i32
    return %arg0, %arg1 : i32, i32
  }
  func.func @transform_1(%arg0: i32, %arg1: i32) -> (i32, i32) {
    %c0_i32 = arith.constant 0 : i32
    return %arg0, %arg1 : i32, i32
  }
  func.func @transform_2(%arg0: i32, %arg1: i32) -> (i32, i32) {
    %c0_i32 = arith.constant 0 : i32
    %c0_i32_0 = arith.constant 0 : i32
    return %arg0, %c0_i32 : i32, i32
  }
}

</mosaic_0001>

<bundles_post_ra>
// kernel: tversky_loss.1
= control target key start
LH: loop header
LB: loop body
LE: loop exit
PB: predicated region body
PF: predicated region fallthrough
CT: control target
= control target key end

     0   :  { %vm60_vm0 = vcmask 7168   ;;  %vm62_vm1 = vcmask 15360   ;;  %vm64_vm2 = vcmask 23552   ;;  %s110_s0 = inlined_call_operand.vmem [shape: f32[8,256], index: 0, kind: input, shape index: {}]   ;;  %s111_s1 = inlined_call_operand.vmem [shape: f32[8,256], index: 1, kind: input, shape index: {}]   ;;  %s112_s2 = inlined_call_operand.vmem [shape: f32[8,3], index: 2, kind: output, shape index: {}]  }
   0x1   :  { %v18_v0 = vld [vmem:[%s110_s0] sm:$0xff]  ;;  %v19_v1 = vld [vmem:[%s110_s0 + $0x8] sm:$0xff] }
   0x2   :  { %v70_v2 = vmul.f32 -1.442695, %v18_v0  ;;  %v71_v3 = vmul.f32 -1.442695, %v19_v1  ;;  %v32_v8 = vld [vmem:[%s111_s1] sm:$0xff]  ;;  %v33_v9 = vld [vmem:[%s111_s1 + $0x8] sm:$0xff] }
   0x3   :  { %v41_v16 = vadd.f32 %v33_v9, %v32_v8 }
   0x4   :  { %72 = vpow2.f32 %v70_v2 }
   0x5   :  { %74 = vpow2.f32 %v71_v3 }
   0xe   :  { %v73_v4 = vpop.eup %72 }
   0xf   :  { %v75_v5 = vpop.eup %74  ;;  %v26_v6 = vadd.f32 1.0, %v73_v4 }
  0x10   :  { %v27_v7 = vadd.f32 1.0, %v75_v5 }
  0x11   :  { %76 = vrcp.f32 %v26_v6 }
  0x12   :  { %78 = vrcp.f32 %v27_v7 }
  0x1b   :  { %v77_v10 = vpop.eup %76 }
  0x1c   :  { %v79_v11 = vpop.eup %78  ;;  %v34_v12 = vmul.f32 %v77_v10, %v32_v8 }
  0x1d   :  { %v35_v13 = vmul.f32 %v79_v11, %v33_v9  ;;  %v45_v14 = vadd.f32 %v79_v11, %v77_v10 }
  0x1f   :  { %v37_v15 = vadd.f32 %v35_v13, %v34_v12  ;;  %58 = vadd.xlane.f32.xlu1 %v45_v14 }
  0x21   :  { %52 = vadd.xlane.f32.xlu0 %v37_v15 }
  0x25   :  { %55 = vadd.xlane.f32.xlu0 %v41_v16 }
  0xac   :  { %v59_v18 = vpop.xlane.xlu1 %58 }
  0xae   :  { %v53_v17 = vpop.xlane.xlu0 %52 }
  0xb2   :  { %v56_v19 = vpop.xlane.xlu0 %55 }
  0xb3   :  { %v61_v20 = vsel %vm60_vm0, %v53_v17, %v56_v19 }
  0xb4   :  { %v63_v21 = vsel %vm62_vm1, %v61_v20, %v59_v18 }
  0xb5   :  { %65 = vst.msk [vmem:[%s112_s2] sm:$0xff] %vm64_vm2, %v63_v21 }

</bundles_post_ra>
